<compile_context>
chip_gen: v5e
topology: v5e:2x2
jax: 0.10.0
libtpu: 0.0.40
codegen_flags: <defaults>
</compile_context>

<pallas_src>
import functools

import jax
import jax.numpy as jnp
from jax.experimental import pallas as pl
from jax.experimental.pallas import tpu as pltpu


# ----------------------------- host-side (hoisted) weight builders -----------------------------

def _resize_weights_host(out_size, src_size, crop_size, crop_off, flip, nearest):
    """(out_size, src_size) interpolation matrix W: out_axis = W @ src_axis for crop+resize+flip."""
    o = jnp.arange(out_size, dtype=jnp.int32)
    s = jnp.arange(src_size, dtype=jnp.int32)
    o = jnp.where(flip == 1, out_size - 1 - o, o)
    scale = crop_size.astype(jnp.float32) / float(out_size)
    if nearest:                      # torch 'nearest': src = floor(dst * in/out)
        k = jnp.floor(o.astype(jnp.float32) * scale).astype(jnp.int32)
        k = jnp.minimum(k, crop_size - 1) + crop_off
        return (s[None, :] == k[:, None]).astype(jnp.float32)
    # torch bilinear, align_corners=False
    # TODO(synk): torchvision v2 uses antialiased bilinear when downscaling; plain bilinear here.
    src = jnp.maximum((o.astype(jnp.float32) + 0.5) * scale - 0.5, 0.0)
    k0 = jnp.floor(src).astype(jnp.int32)
    f = src - k0.astype(jnp.float32)
    k1 = jnp.minimum(k0 + 1, crop_size - 1) + crop_off
    k0 = jnp.minimum(k0, crop_size - 1) + crop_off
    return ((s[None, :] == k0[:, None]).astype(jnp.float32) * (1.0 - f)[:, None]
            + (s[None, :] == k1[:, None]).astype(jnp.float32) * f[:, None])


def _rotate_weights_host(S, pad, cos_a, sin_a, nearest):
    """Rotation weights Wy[i,j,y], Wx[i,j,x] (reflection padding + center crop baked in)."""
    center = (S + 2 * pad - 1) * 0.5
    ii = jnp.arange(S, dtype=jnp.float32)[:, None]
    jj = jnp.arange(S, dtype=jnp.float32)[None, :]
    xo = jj + pad - center
    yo = ii + pad - center
    # torchvision inverse affine for rotate(angle): [cosA, -sinA; sinA, cosA]
    ux = cos_a * xo - sin_a * yo + center - pad      # source x in unpadded coords, (S, S)
    uy = sin_a * xo + cos_a * yo + center - pad      # source y in unpadded coords, (S, S)
    kk = jnp.arange(S, dtype=jnp.int32)[None, None, :]

    def reflect(k):
        k = jnp.where(k < 0, -k, k)
        return jnp.where(k > S - 1, 2 * (S - 1) - k, k)

    def weights(u):
        if nearest:
            kn = reflect(jnp.floor(u + 0.5).astype(jnp.int32))
            return (kk == kn[:, :, None]).astype(jnp.float32)
        k0 = jnp.floor(u).astype(jnp.int32)
        f = u - k0.astype(jnp.float32)
        k0r = reflect(k0)
        k1r = reflect(k0 + 1)
        return ((kk == k0r[:, :, None]).astype(jnp.float32) * (1.0 - f)[:, :, None]
                + (kk == k1r[:, :, None]).astype(jnp.float32) * f[:, :, None])

    return weights(uy), weights(ux)   # Wy (i, j, y), Wx (i, j, x)


# ----------------------------- Pallas kernels -----------------------------

def resize_kernel(ryb_ref, rxtb_ref, ryn_ref, rxtn_ref, img_ref, msk_ref, oimg_ref, omsk_ref):
    """Fused image(bilinear, bf16 MXU) + mask(nearest, exact f32) crop+resize+flip: Ry @ x @ RxT."""
    C = img_ref.shape[1]
    ry = ryb_ref[...]            # (P, H)  bf16
    rxt = rxtb_ref[...]          # (W, P)  bf16
    for c in range(C):           # temps here are tiny (P x W); unroll is cheap
        xc = img_ref[0, c].astype(jnp.bfloat16)                               # (H, W)
        t = jnp.dot(ry, xc, preferred_element_type=jnp.float32)               # (P, W)
        yc = jnp.dot(t.astype(jnp.bfloat16), rxt,
                     preferred_element_type=jnp.float32)                      # (P, P)
        oimg_ref[0, c] = yc.astype(oimg_ref.dtype)
    # mask: one-hot nearest weights in f32 -> exact label selection
    ryn = ryn_ref[...]           # (P, H)  f32
    rxtn = rxtn_ref[...]         # (W, P)  f32
    m = msk_ref[0, 0]
    tm = jnp.dot(ryn, m, preferred_element_type=jnp.float32)
    omsk_ref[0, 0] = jnp.dot(tm, rxtn, preferred_element_type=jnp.float32).astype(omsk_ref.dtype)


def rotate_kernel(wyb_ref, wxb_ref, wyn_ref, wxn_ref, img_ref, msk_ref, oimg_ref, omsk_ref):
    """Rotation for one (row-tile, batch) step.

    out[c,i,j] = sum_x Wx[i,j,x] * (sum_y Wy[i,j,y] * img[c,y,x])
    The y-contraction is one big MXU matmul: Wy.reshape(Ti*S, S) @ img_c  (no transpose needed,
    since y is the sublane axis of img_c); the x-contraction is a lane multiply-reduce.
    """
    Ti, S, _ = wyb_ref.shape
    C = img_ref.shape[1]
    wy2 = wyb_ref[...].reshape(Ti * S, S)            # (Ti*S, S_y)  bf16
    wx = wxb_ref[...].astype(jnp.float32)            # (Ti, S_j, S_x)
    for c in range(C):                               # slab-sized temps only (Ti*S, S)
        xc = img_ref[0, c].astype(jnp.bfloat16)                               # (S_y, S_x)
        t = jnp.dot(wy2, xc, preferred_element_type=jnp.float32)              # (Ti*S_j, S_x)
        out_c = jnp.sum(wx * t.reshape(Ti, S, S), axis=-1)                    # (Ti, S_j)
        oimg_ref[0, c] = out_c.astype(oimg_ref.dtype)
    # mask: nearest (one-hot, exact after bf16->f32 cast), f32 matmul keeps labels exact
    wyn2 = wyn_ref[...].reshape(Ti * S, S).astype(jnp.float32)
    wxn = wxn_ref[...].astype(jnp.float32)
    m = msk_ref[0, 0]
    tm = jnp.dot(wyn2, m, preferred_element_type=jnp.float32)
    omsk_ref[0, 0] = jnp.sum(wxn * tm.reshape(Ti, S, S), axis=-1).astype(omsk_ref.dtype)


def noise_kernel(x_ref, n_ref, o_ref, *, std_ratio):
    """add_gaussian_noise: per-(b,c) min/max over H,W, scaled noise, clamp."""
    x = x_ref[...]
    mn = jnp.min(jnp.min(x, axis=3, keepdims=True), axis=2, keepdims=True)
    mx = jnp.max(jnp.max(x, axis=3, keepdims=True), axis=2, keepdims=True)
    std = std_ratio * (mx - mn + 1e-8)
    y = x + n_ref[...] * std
    y = jnp.minimum(jnp.maximum(y, mn), mx)
    o_ref[...] = y.astype(o_ref.dtype)


# ----------------------------- pallas_call wrappers -----------------------------

def _call_resize(ry_b, rxt_b, ry_n, rxt_n, image, mask_f, out_size):
    B, C, H, W = image.shape
    P = out_size
    return pl.pallas_call(
        resize_kernel,
        out_shape=(jax.ShapeDtypeStruct((B, C, P, P), jnp.float32),
                   jax.ShapeDtypeStruct((B, 1, P, P), jnp.float32)),
        grid_spec=pltpu.PrefetchScalarGridSpec(
            num_scalar_prefetch=0,
            grid=(B,),
            in_specs=[
                pl.BlockSpec((P, H), lambda b: (0, 0)),
                pl.BlockSpec((W, P), lambda b: (0, 0)),
                pl.BlockSpec((P, H), lambda b: (0, 0)),
                pl.BlockSpec((W, P), lambda b: (0, 0)),
                pl.BlockSpec((1, C, H, W), lambda b: (b, 0, 0, 0)),
                pl.BlockSpec((1, 1, H, W), lambda b: (b, 0, 0, 0)),
            ],
            out_specs=[
                pl.BlockSpec((1, C, P, P), lambda b: (b, 0, 0, 0)),
                pl.BlockSpec((1, 1, P, P), lambda b: (b, 0, 0, 0)),
            ],
        ),
        compiler_params=pltpu.CompilerParams(dimension_semantics=("parallel",)),
    )(ry_b, rxt_b, ry_n, rxt_n, image, mask_f)


def _pick_row_tile(S):
    for t in (16, 8, 32):
        if S % t == 0 and S // t >= 2:
            return t
    return S


def _call_rotate(wy_b, wx_b, wy_n, wx_n, img, msk):
    B, C, S, _ = img.shape
    Ti = _pick_row_tile(S)
    nt = S // Ti
    return pl.pallas_call(
        rotate_kernel,
        out_shape=(jax.ShapeDtypeStruct((B, C, S, S), jnp.float32),
                   jax.ShapeDtypeStruct((B, 1, S, S), jnp.float32)),
        grid_spec=pltpu.PrefetchScalarGridSpec(
            num_scalar_prefetch=0,
            grid=(nt, B),   # batch innermost -> weight slab reused across b
            in_specs=[
                pl.BlockSpec((Ti, S, S), lambda it, b: (it, 0, 0)),
                pl.BlockSpec((Ti, S, S), lambda it, b: (it, 0, 0)),
                pl.BlockSpec((Ti, S, S), lambda it, b: (it, 0, 0)),
                pl.BlockSpec((Ti, S, S), lambda it, b: (it, 0, 0)),
                pl.BlockSpec((1, C, S, S), lambda it, b: (b, 0, 0, 0)),
                pl.BlockSpec((1, 1, S, S), lambda it, b: (b, 0, 0, 0)),
            ],
            out_specs=[
                pl.BlockSpec((1, C, Ti, S), lambda it, b: (b, 0, it, 0)),
                pl.BlockSpec((1, 1, Ti, S), lambda it, b: (b, 0, it, 0)),
            ],
        ),
        compiler_params=pltpu.CompilerParams(
            dimension_semantics=("parallel", "parallel")),
    )(wy_b, wx_b, wy_n, wx_n, img, msk)


def _call_noise(x, noise, std_ratio):
    B, C, S, _ = x.shape
    kern = functools.partial(noise_kernel, std_ratio=std_ratio)
    return pl.pallas_call(
        kern,
        out_shape=jax.ShapeDtypeStruct((B, C, S, S), jnp.float32),
        grid_spec=pltpu.PrefetchScalarGridSpec(
            num_scalar_prefetch=0,
            grid=(B,),
            in_specs=[pl.BlockSpec((1, C, S, S), lambda b: (b, 0, 0, 0)),
                      pl.BlockSpec((1, C, S, S), lambda b: (b, 0, 0, 0))],
            out_specs=pl.BlockSpec((1, C, S, S), lambda b: (b, 0, 0, 0)),
        ),
        compiler_params=pltpu.CompilerParams(dimension_semantics=("parallel",)),
    )(x, noise)


# ----------------------------- module-equivalent forward -----------------------------

def consistent_transform(sample, key, h_w=32, degrees=30.0, p=0.5, std_ratio=0.02):
    image = sample['image'].astype(jnp.float32)          # (B, C, H, W)
    mask = sample['mask']                                 # (B, H, W) int
    mask_f = mask.astype(jnp.float32)[:, None]            # (B, 1, H, W)
    B, C, H, W = image.shape
    ks = jax.random.split(key, 7)

    # --- RandomResizedCrop params, scale=(0.8, 1.0), ratio=(3/4, 4/3) ---
    # TODO(synk): torchvision does up-to-10-attempt rejection sampling; single clamped attempt here.
    area = float(H * W)
    target_area = jax.random.uniform(ks[0], (), minval=0.8, maxval=1.0) * area
    ratio = jnp.exp(jax.random.uniform(ks[1], (), minval=jnp.log(3.0 / 4.0),
                                       maxval=jnp.log(4.0 / 3.0)))
    cw = jnp.clip(jnp.round(jnp.sqrt(target_area * ratio)), 1, W).astype(jnp.int32)
    ch = jnp.clip(jnp.round(jnp.sqrt(target_area / ratio)), 1, H).astype(jnp.int32)
    top = jnp.floor(jax.random.uniform(ks[2], ()) * (H - ch + 1).astype(jnp.float32)).astype(jnp.int32)
    left = jnp.floor(jax.random.uniform(ks[3], ()) * (W - cw + 1).astype(jnp.float32)).astype(jnp.int32)
    fh = (jax.random.uniform(ks[4], ()) < p).astype(jnp.int32)   # horizontal -> width axis
    fv = (jax.random.uniform(ks[5], ()) < p).astype(jnp.int32)   # vertical   -> height axis

    # --- rotation angle ~ U(-degrees, degrees) ---
    kang, knoise = jax.random.split(ks[6])
    angle = jax.random.uniform(kang, (), minval=-degrees, maxval=degrees)
    rad = angle * (jnp.pi / 180.0)
    cos_a, sin_a = jnp.cos(rad), jnp.sin(rad)

    # --- hoisted interpolation weights (shared across batch & channels) ---
    Ry_b = _resize_weights_host(h_w, H, ch, top, fv, nearest=False).astype(jnp.bfloat16)
    RxT_b = _resize_weights_host(h_w, W, cw, left, fh, nearest=False).T.astype(jnp.bfloat16)
    Ry_n = _resize_weights_host(h_w, H, ch, top, fv, nearest=True)          # f32 (exact labels)
    RxT_n = _resize_weights_host(h_w, W, cw, left, fh, nearest=True).T      # f32

    img_rs, msk_rs = _call_resize(Ry_b, RxT_b, Ry_n, RxT_n, image, mask_f, h_w)

    S = h_w
    diag = int((S ** 2 + S ** 2) ** 0.5)
    pad = (diag - S) // 2 + 1
    Wy_b, Wx_b = _rotate_weights_host(S, pad, cos_a, sin_a, nearest=False)
    Wy_n, Wx_n = _rotate_weights_host(S, pad, cos_a, sin_a, nearest=True)
    # bf16 halves weight streaming; one-hot nearest weights stay exact after the bf16 round-trip.
    Wy_b, Wx_b = Wy_b.astype(jnp.bfloat16), Wx_b.astype(jnp.bfloat16)
    Wy_n, Wx_n = Wy_n.astype(jnp.bfloat16), Wx_n.astype(jnp.bfloat16)

    img_rot, msk_rot = _call_rotate(Wy_b, Wx_b, Wy_n, Wx_n, img_rs, msk_rs)

    # TODO(synk): in-kernel PRNG (pltpu.prng_random_bits -> Gaussian) would drop this HBM stream,
    # but Box-Muller needs sin/cos which are not guaranteed to lower in Mosaic; stream noise in.
    noise = jax.random.normal(knoise, img_rot.shape, jnp.float32)
    img_out = _call_noise(img_rot, noise, std_ratio)
    msk_out = jnp.round(msk_rot[:, 0]).astype(mask.dtype)
    return {'image': img_out, 'mask': msk_out}


# ----------------------------- demo -----------------------------

if __name__ == "__main__":
    key = jax.random.PRNGKey(0)
    kimg, kmask, kt = jax.random.split(key, 3)

    B, C, H, W = 2, 4, 48, 48
    HW = 32  # module default h_w=128; small value for the demo (keep multiples of 128 in prod)
    image = jax.random.normal(kimg, (B, C, H, W), jnp.float32)
    mask = jax.random.randint(kmask, (B, H, W), 0, 5, dtype=jnp.int32)

    out = consistent_transform({'image': image, 'mask': mask}, kt,
                               h_w=HW, degrees=30.0, p=0.5)
    jax.block_until_ready(out['image'])
    jax.block_until_ready(out['mask'])

    assert out['image'].shape == (B, C, HW, HW) and out['image'].dtype == jnp.float32
    assert out['mask'].shape == (B, HW, HW) and out['mask'].dtype == jnp.int32
    assert bool(jnp.all(jnp.isfinite(out['image'])))
    print("KERNEL_OK")
</pallas_src>

<mosaic_0001>
module attributes {stable_mosaic.version = 11 : i64} {
  func.func @resize_kernel(%arg0: i32, %arg1: memref<32x48xbf16, #tpu.memory_space<vmem>>, %arg2: memref<48x32xbf16, #tpu.memory_space<vmem>>, %arg3: memref<32x48xf32, #tpu.memory_space<vmem>>, %arg4: memref<48x32xf32, #tpu.memory_space<vmem>>, %arg5: memref<1x4x48x48xf32, #tpu.memory_space<vmem>>, %arg6: memref<1x1x48x48xf32, #tpu.memory_space<vmem>>, %arg7: memref<1x4x32x32xf32, #tpu.memory_space<vmem>>, %arg8: memref<1x1x32x32xf32, #tpu.memory_space<vmem>>) attributes {dimension_semantics = [#tpu.dimension_semantics<parallel>], iteration_bounds = array<i64: 2>, scalar_prefetch = 0 : i64, scratch_operands = 0 : i64, tpu.core_type = #tpu.core_type<tc>, window_params = [{pipeline_mode = #tpu.pipeline_mode<synchronous>, transform_indices = @transform_0, window_bounds = array<i64: 32, 48>}, {pipeline_mode = #tpu.pipeline_mode<synchronous>, transform_indices = @transform_1, window_bounds = array<i64: 48, 32>}, {pipeline_mode = #tpu.pipeline_mode<synchronous>, transform_indices = @transform_2, window_bounds = array<i64: 32, 48>}, {pipeline_mode = #tpu.pipeline_mode<synchronous>, transform_indices = @transform_3, window_bounds = array<i64: 48, 32>}, {transform_indices = @transform_4, window_bounds = array<i64: 1, 4, 48, 48>}, {transform_indices = @transform_5, window_bounds = array<i64: 1, 1, 48, 48>}, {transform_indices = @transform_6, window_bounds = array<i64: 1, 4, 32, 32>}, {transform_indices = @transform_7, window_bounds = array<i64: 1, 1, 32, 32>}]} {
    %c0 = arith.constant 0 : index
    %c0_0 = arith.constant 0 : index
    %0 = vector.load %arg1[%c0, %c0_0] : memref<32x48xbf16, #tpu.memory_space<vmem>>, vector<32x48xbf16>
    %c0_1 = arith.constant 0 : index
    %c0_2 = arith.constant 0 : index
    %1 = vector.load %arg2[%c0_1, %c0_2] : memref<48x32xbf16, #tpu.memory_space<vmem>>, vector<48x32xbf16>
    %c0_3 = arith.constant 0 : index
    %c0_4 = arith.constant 0 : index
    %c0_5 = arith.constant 0 : index
    %c0_6 = arith.constant 0 : index
    %2 = vector.load %arg5[%c0_3, %c0_4, %c0_5, %c0_6] : memref<1x4x48x48xf32, #tpu.memory_space<vmem>>, vector<1x1x48x48xf32>
    %3 = vector.shape_cast %2 : vector<1x1x48x48xf32> to vector<48x48xf32>
    %4 = arith.truncf %3 : vector<48x48xf32> to vector<48x48xbf16>
    %cst = arith.constant dense<0.000000e+00> : vector<32x48xf32>
    %5 = tpu.matmul %0, %4, %cst {dimension_numbers = #tpu.dot_dimension_numbers<[1], [0], [0], [1], [0, 0, 1, 1], [], []>} : vector<32x48xbf16>, vector<48x48xbf16>, vector<32x48xf32> -> vector<32x48xf32>
    %6 = arith.truncf %5 : vector<32x48xf32> to vector<32x48xbf16>
    %cst_7 = arith.constant dense<0.000000e+00> : vector<32x32xf32>
    %7 = tpu.matmul %6, %1, %cst_7 {dimension_numbers = #tpu.dot_dimension_numbers<[1], [0], [0], [1], [0, 0, 1, 1], [], []>} : vector<32x48xbf16>, vector<48x32xbf16>, vector<32x32xf32> -> vector<32x32xf32>
    %c0_8 = arith.constant 0 : index
    %c0_9 = arith.constant 0 : index
    %c0_10 = arith.constant 0 : index
    %c0_11 = arith.constant 0 : index
    %8 = vector.load %arg7[%c0_8, %c0_9, %c0_10, %c0_11] : memref<1x4x32x32xf32, #tpu.memory_space<vmem>>, vector<1x1x32x32xf32>
    %9 = vector.shape_cast %8 : vector<1x1x32x32xf32> to vector<32x32xf32>
    %10 = vector.shape_cast %7 : vector<32x32xf32> to vector<1x1x32x32xf32>
    tpu.vector_store %arg7[%c0_8, %c0_9, %c0_10, %c0_11], %10 {strides = array<i32>} : memref<1x4x32x32xf32, #tpu.memory_space<vmem>>, vector<1x1x32x32xf32>,
    %c0_12 = arith.constant 0 : index
    %c1 = arith.constant 1 : index
    %c0_13 = arith.constant 0 : index
    %c0_14 = arith.constant 0 : index
    %11 = vector.load %arg5[%c0_12, %c1, %c0_13, %c0_14] : memref<1x4x48x48xf32, #tpu.memory_space<vmem>>, vector<1x1x48x48xf32>
    %12 = vector.shape_cast %11 : vector<1x1x48x48xf32> to vector<48x48xf32>
    %13 = arith.truncf %12 : vector<48x48xf32> to vector<48x48xbf16>
    %cst_15 = arith.constant dense<0.000000e+00> : vector<32x48xf32>
    %14 = tpu.matmul %0, %13, %cst_15 {dimension_numbers = #tpu.dot_dimension_numbers<[1], [0], [0], [1], [0, 0, 1, 1], [], []>} : vector<32x48xbf16>, vector<48x48xbf16>, vector<32x48xf32> -> vector<32x48xf32>
    %15 = arith.truncf %14 : vector<32x48xf32> to vector<32x48xbf16>
    %cst_16 = arith.constant dense<0.000000e+00> : vector<32x32xf32>
    %16 = tpu.matmul %15, %1, %cst_16 {dimension_numbers = #tpu.dot_dimension_numbers<[1], [0], [0], [1], [0, 0, 1, 1], [], []>} : vector<32x48xbf16>, vector<48x32xbf16>, vector<32x32xf32> -> vector<32x32xf32>
    %c0_17 = arith.constant 0 : index
    %c1_18 = arith.constant 1 : index
    %c0_19 = arith.constant 0 : index
    %c0_20 = arith.constant 0 : index
    %17 = vector.load %arg7[%c0_17, %c1_18, %c0_19, %c0_20] : memref<1x4x32x32xf32, #tpu.memory_space<vmem>>, vector<1x1x32x32xf32>
    %18 = vector.shape_cast %17 : vector<1x1x32x32xf32> to vector<32x32xf32>
    %19 = vector.shape_cast %16 : vector<32x32xf32> to vector<1x1x32x32xf32>
    tpu.vector_store %arg7[%c0_17, %c1_18, %c0_19, %c0_20], %19 {strides = array<i32>} : memref<1x4x32x32xf32, #tpu.memory_space<vmem>>, vector<1x1x32x32xf32>,
    %c0_21 = arith.constant 0 : index
    %c2 = arith.constant 2 : index
    %c0_22 = arith.constant 0 : index
    %c0_23 = arith.constant 0 : index
    %20 = vector.load %arg5[%c0_21, %c2, %c0_22, %c0_23] : memref<1x4x48x48xf32, #tpu.memory_space<vmem>>, vector<1x1x48x48xf32>
    %21 = vector.shape_cast %20 : vector<1x1x48x48xf32> to vector<48x48xf32>
    %22 = arith.truncf %21 : vector<48x48xf32> to vector<48x48xbf16>
    %cst_24 = arith.constant dense<0.000000e+00> : vector<32x48xf32>
    %23 = tpu.matmul %0, %22, %cst_24 {dimension_numbers = #tpu.dot_dimension_numbers<[1], [0], [0], [1], [0, 0, 1, 1], [], []>} : vector<32x48xbf16>, vector<48x48xbf16>, vector<32x48xf32> -> vector<32x48xf32>
    %24 = arith.truncf %23 : vector<32x48xf32> to vector<32x48xbf16>
    %cst_25 = arith.constant dense<0.000000e+00> : vector<32x32xf32>
    %25 = tpu.matmul %24, %1, %cst_25 {dimension_numbers = #tpu.dot_dimension_numbers<[1], [0], [0], [1], [0, 0, 1, 1], [], []>} : vector<32x48xbf16>, vector<48x32xbf16>, vector<32x32xf32> -> vector<32x32xf32>
    %c0_26 = arith.constant 0 : index
    %c2_27 = arith.constant 2 : index
    %c0_28 = arith.constant 0 : index
    %c0_29 = arith.constant 0 : index
    %26 = vector.load %arg7[%c0_26, %c2_27, %c0_28, %c0_29] : memref<1x4x32x32xf32, #tpu.memory_space<vmem>>, vector<1x1x32x32xf32>
    %27 = vector.shape_cast %26 : vector<1x1x32x32xf32> to vector<32x32xf32>
    %28 = vector.shape_cast %25 : vector<32x32xf32> to vector<1x1x32x32xf32>
    tpu.vector_store %arg7[%c0_26, %c2_27, %c0_28, %c0_29], %28 {strides = array<i32>} : memref<1x4x32x32xf32, #tpu.memory_space<vmem>>, vector<1x1x32x32xf32>,
    %c0_30 = arith.constant 0 : index
    %c3 = arith.constant 3 : index
    %c0_31 = arith.constant 0 : index
    %c0_32 = arith.constant 0 : index
    %29 = vector.load %arg5[%c0_30, %c3, %c0_31, %c0_32] : memref<1x4x48x48xf32, #tpu.memory_space<vmem>>, vector<1x1x48x48xf32>
    %30 = vector.shape_cast %29 : vector<1x1x48x48xf32> to vector<48x48xf32>
    %31 = arith.truncf %30 : vector<48x48xf32> to vector<48x48xbf16>
    %cst_33 = arith.constant dense<0.000000e+00> : vector<32x48xf32>
    %32 = tpu.matmul %0, %31, %cst_33 {dimension_numbers = #tpu.dot_dimension_numbers<[1], [0], [0], [1], [0, 0, 1, 1], [], []>} : vector<32x48xbf16>, vector<48x48xbf16>, vector<32x48xf32> -> vector<32x48xf32>
    %33 = arith.truncf %32 : vector<32x48xf32> to vector<32x48xbf16>
    %cst_34 = arith.constant dense<0.000000e+00> : vector<32x32xf32>
    %34 = tpu.matmul %33, %1, %cst_34 {dimension_numbers = #tpu.dot_dimension_numbers<[1], [0], [0], [1], [0, 0, 1, 1], [], []>} : vector<32x48xbf16>, vector<48x32xbf16>, vector<32x32xf32> -> vector<32x32xf32>
    %c0_35 = arith.constant 0 : index
    %c3_36 = arith.constant 3 : index
    %c0_37 = arith.constant 0 : index
    %c0_38 = arith.constant 0 : index
    %35 = vector.load %arg7[%c0_35, %c3_36, %c0_37, %c0_38] : memref<1x4x32x32xf32, #tpu.memory_space<vmem>>, vector<1x1x32x32xf32>
    %36 = vector.shape_cast %35 : vector<1x1x32x32xf32> to vector<32x32xf32>
    %37 = vector.shape_cast %34 : vector<32x32xf32> to vector<1x1x32x32xf32>
    tpu.vector_store %arg7[%c0_35, %c3_36, %c0_37, %c0_38], %37 {strides = array<i32>} : memref<1x4x32x32xf32, #tpu.memory_space<vmem>>, vector<1x1x32x32xf32>,
    %c0_39 = arith.constant 0 : index
    %c0_40 = arith.constant 0 : index
    %38 = vector.load %arg3[%c0_39, %c0_40] : memref<32x48xf32, #tpu.memory_space<vmem>>, vector<32x48xf32>
    %c0_41 = arith.constant 0 : index
    %c0_42 = arith.constant 0 : index
    %39 = vector.load %arg4[%c0_41, %c0_42] : memref<48x32xf32, #tpu.memory_space<vmem>>, vector<48x32xf32>
    %c0_43 = arith.constant 0 : index
    %c0_44 = arith.constant 0 : index
    %c0_45 = arith.constant 0 : index
    %c0_46 = arith.constant 0 : index
    %40 = vector.load %arg6[%c0_43, %c0_44, %c0_45, %c0_46] : memref<1x1x48x48xf32, #tpu.memory_space<vmem>>, vector<1x1x48x48xf32>
    %41 = vector.shape_cast %40 : vector<1x1x48x48xf32> to vector<48x48xf32>
    %cst_47 = arith.constant dense<0.000000e+00> : vector<32x48xf32>
    %42 = tpu.matmul %38, %41, %cst_47 {dimension_numbers = #tpu.dot_dimension_numbers<[1], [0], [0], [1], [0, 0, 1, 1], [], []>} : vector<32x48xf32>, vector<48x48xf32>, vector<32x48xf32> -> vector<32x48xf32>
    %cst_48 = arith.constant dense<0.000000e+00> : vector<32x32xf32>
    %43 = tpu.matmul %42, %39, %cst_48 {dimension_numbers = #tpu.dot_dimension_numbers<[1], [0], [0], [1], [0, 0, 1, 1], [], []>} : vector<32x48xf32>, vector<48x32xf32>, vector<32x32xf32> -> vector<32x32xf32>
    %c0_49 = arith.constant 0 : index
    %c0_50 = arith.constant 0 : index
    %c0_51 = arith.constant 0 : index
    %c0_52 = arith.constant 0 : index
    %44 = vector.load %arg8[%c0_49, %c0_50, %c0_51, %c0_52] : memref<1x1x32x32xf32, #tpu.memory_space<vmem>>, vector<1x1x32x32xf32>
    %45 = vector.shape_cast %44 : vector<1x1x32x32xf32> to vector<32x32xf32>
    %46 = vector.shape_cast %43 : vector<32x32xf32> to vector<1x1x32x32xf32>
    tpu.vector_store %arg8[%c0_49, %c0_50, %c0_51, %c0_52], %46 {strides = array<i32>} : memref<1x1x32x32xf32, #tpu.memory_space<vmem>>, vector<1x1x32x32xf32>,
    return
  }
  func.func @transform_0(%arg0: i32) -> (i32, i32) {
    %c0_i32 = arith.constant 0 : i32
    %c0_i32_0 = arith.constant 0 : i32
    %c0_i32_1 = arith.constant 0 : i32
    return %c0_i32, %c0_i32_0 : i32, i32
  }
  func.func @transform_1(%arg0: i32) -> (i32, i32) {
    %c0_i32 = arith.constant 0 : i32
    %c0_i32_0 = arith.constant 0 : i32
    %c0_i32_1 = arith.constant 0 : i32
    return %c0_i32, %c0_i32_0 : i32, i32
  }
  func.func @transform_2(%arg0: i32) -> (i32, i32) {
    %c0_i32 = arith.constant 0 : i32
    %c0_i32_0 = arith.constant 0 : i32
    %c0_i32_1 = arith.constant 0 : i32
    return %c0_i32, %c0_i32_0 : i32, i32
  }
  func.func @transform_3(%arg0: i32) -> (i32, i32) {
    %c0_i32 = arith.constant 0 : i32
    %c0_i32_0 = arith.constant 0 : i32
    %c0_i32_1 = arith.constant 0 : i32
    return %c0_i32, %c0_i32_0 : i32, i32
  }
  func.func @transform_4(%arg0: i32) -> (i32, i32, i32, i32) {
    %c0_i32 = arith.constant 0 : i32
    %c0_i32_0 = arith.constant 0 : i32
    %c0_i32_1 = arith.constant 0 : i32
    %c0_i32_2 = arith.constant 0 : i32
    return %arg0, %c0_i32, %c0_i32_0, %c0_i32_1 : i32, i32, i32, i32
  }
  func.func @transform_5(%arg0: i32) -> (i32, i32, i32, i32) {
    %c0_i32 = arith.constant 0 : i32
    %c0_i32_0 = arith.constant 0 : i32
    %c0_i32_1 = arith.constant 0 : i32
    %c0_i32_2 = arith.constant 0 : i32
    return %arg0, %c0_i32, %c0_i32_0, %c0_i32_1 : i32, i32, i32, i32
  }
  func.func @transform_6(%arg0: i32) -> (i32, i32, i32, i32) {
    %c0_i32 = arith.constant 0 : i32
    %c0_i32_0 = arith.constant 0 : i32
    %c0_i32_1 = arith.constant 0 : i32
    %c0_i32_2 = arith.constant 0 : i32
    return %arg0, %c0_i32, %c0_i32_0, %c0_i32_1 : i32, i32, i32, i32
  }
  func.func @transform_7(%arg0: i32) -> (i32, i32, i32, i32) {
    %c0_i32 = arith.constant 0 : i32
    %c0_i32_0 = arith.constant 0 : i32
    %c0_i32_1 = arith.constant 0 : i32
    %c0_i32_2 = arith.constant 0 : i32
    return %arg0, %c0_i32, %c0_i32_0, %c0_i32_1 : i32, i32, i32, i32
  }
}

</mosaic_0001>

<bundles_post_ra>
// kernel: tpu_custom_call.1
= control target key start
LH: loop header
LB: loop body
LE: loop exit
PB: predicated region body
PF: predicated region fallthrough
CT: control target
= control target key end

     0   :  { %s1605_s0 = inlined_call_operand.vmem [shape: bf16[32,48], index: 0, kind: input, shape index: {}]   ;;  %s1606_s1 = inlined_call_operand.vmem [shape: bf16[48,32], index: 1, kind: input, shape index: {}]   ;;  %s1607_s2 = inlined_call_operand.vmem [shape: f32[32,48], index: 2, kind: input, shape index: {}]   ;;  %s1608_s3 = inlined_call_operand.vmem [shape: f32[48,32], index: 3, kind: input, shape index: {}]   ;;  %s1609_s4 = inlined_call_operand.hbm [shape: f32[2,4,48,48], index: 4, kind: input, shape index: {}]   ;;  %s1610_s5 = inlined_call_operand.hbm [shape: f32[2,1,48,48], index: 5, kind: input, shape index: {}]   ;;  %s1611_s6 = inlined_call_operand.hbm [shape: f32[2,4,32,32], index: 6, kind: output, shape index: {0}]   ;;  %s1612_s7 = inlined_call_operand.hbm [shape: f32[2,1,32,32], index: 7, kind: output, shape index: {1}]  }
   0x1   :  { %1618 = sst [smem:[#allocation17_spill]] %s1609_s4 }
   0x2   :  { %13 = vsyncpa [#allocation3], 0 }
   0x3   :  { %15 = vsyncpa [#allocation3 + $0x1], 0 }
   0x4   :  { %16 = vsyncpa [#allocation6], 0 }
   0x5   :  { %18 = vsyncpa [#allocation6 + $0x1], 0 }
   0x6   :  { %19 = vsyncpa [#allocation4], 0 }
   0x7   :  { %21 = vsyncpa [#allocation4 + $0x1], 0 }
   0x8   :  { %22 = vsyncpa [#allocation9], 0 }
   0x9   :  { %24 = vsyncpa [#allocation9 + $0x1], 0  ;;  %s1287_s24 = smov 0   ;;  %s1289_s25 = smov 0  }
   0xa   :  { %s1291_s26 = smov 0   ;;  %s1293_s27 = smov 0  }
   0xb LB: > { %1619 = sst [smem:[#allocation14_spill]] %s1237_s26  ;;  %s1308_s28 = sadd.s32 4294967295, %s1241_s27   ;;  %s1241_s27 = sphi %s1293_s27, %s1630_s27   ;;  %s1237_s26 = sphi %s1291_s26, %s1635_s26   ;;  %s1233_s25 = sphi %s1289_s25, %s1634_s25   ;;  %s1229_s24 = sphi %s1287_s24, %s1633_s24  }
   0xc   : > { %s910_s29 = sadd.s32 4294967294, %s1241_s27   ;;  %s1312_s30 = sadd.s32 1, %s1241_s27  }
   0xd   : > { %1620 = sst [smem:[#allocation15_spill]] %s1312_s30  ;;  %s121_s8 = sadd.s32 1, %s1237_s26 }
   0xe   : > { %s118_s9 = ssub.s32 %s1241_s27, %s1312_s30  ;;  %p128_p0 = scmp.ne.s32.totalorder %s1237_s26, %s1233_s25 }
   0xf   : > { %p119_p1 = scmp.eq.s32.totalorder %s118_s9, 0  ;;  %p129_p2 = scmp.eq.s32.totalorder %s1241_s27, 0 }
  0x10   : > { %p134_p3 = scmp.ne.s32.totalorder %s1233_s25, %s1229_s24  ;;  %p135_p4 = scmp.eq.s32.totalorder %s1308_s28, 0 }
  0x11   : > { %s1324_s10 = scalar_select %p119_p1, %s1237_s26, %s121_s8  }
  0x12   : > { %p130_p5 = por %p129_p2, %p128_p0  ;;  %p1326_p6 = por %p135_p4, %p134_p3 }
  0x13   : > { %1621 = sst [smem:[#allocation16_spill]] %s1324_s10  ;;  %p184_p7 = scmp.eq.s32.totalorder %s1308_s28, 1 }
  0x14   : > { %p190_p8 = scmp.eq.s32.totalorder %s910_s29, 1  ;;  %p912_p9 = scmp.ge.s32.totalorder %s1241_s27, 2 }
  0x15   : > { %p1041_p10 = scmp.lt.s32.totalorder %s1241_s27, 2  ;;  %p1333_p11 = por %p184_p7, %p128_p0 }
  0x16   : > { %p1337_p12 = por %p190_p8, %p134_p3  ;;  %s1342_s14 = sand.u32 1, %s1237_s26  }
  0x17   : > { %s1014_s15 = smul.u32 192, %s1241_s27  ;;  %s1625_s4 = sld [smem:[#allocation17_spill]] }
  0x18   : > { %s1013_s16 = smul.u32 192, %s1342_s14  ;;  %p1349_p13 = pnand %p1041_p10, %p130_p5 }
  0x19   : > { %s249_s29 = scalar_lea.sflag [#allocation3], %s1342_s14 }
  0x1a   : > { %s252_s22 = scalar_lea.vmem [#allocation2], %s1013_s16  ;;  %p1083_p1 = pneg %p1349_p13 }
  0x1b   : > { %s260_s23 = sshll.u32 %s252_s22, 4  ;;  %s261_s23 = int_to_ptr.vmem [resolvable:$true] %s260_s23 }
  0x1d   : > { %s257_s19 = scalar_lea.hbm %s1625_s4, %s1014_s15  ;;  %s1086_s18 = scalar_lea.hbm %s1625_s4, 384 }
  0x1e   : > { %s258_s21 = sshll.u32 %s257_s19, 4  ;;  %s259_s21 = int_to_ptr.hbm [resolvable:$true] %s258_s21 }
  0x1f   : > { %s1079_s8 = sshra.s32 %s259_s21, 4  ;;  %s1080_s8 = int_to_ptr.hbm [resolvable:$true] %s1079_s8 }
  0x20   : > { %s1081_s9 = scalar_lea.hbm %s1080_s8, 192  ;;  %p1087_p4 = scmp.lt.s32.totalorder %s1080_s8, %s1625_s4 }
  0x21   : > { %p1082_p0 = scmp.ne.s32.totalorder %s1080_s8, %s1081_s9  ;;  %p1088_p5 = scmp.lt.s32.totalorder %s1086_s18, %s1081_s9 }
  0x23   : > { %p1084_p2 = pnand %p1083_p1, %p1082_p0  ;;  %p1089_p7 = por %p1088_p5, %p1087_p4 }
  0x25   : > { %p1085_p3 = pneg %p1084_p2 }
  0x27   : > { %p1090_p8 = pnand %p1089_p7, %p1085_p3 }
  0x29   : > { %1093 = shalt.err (!%p1090_p8)
}
  0x2a   : > { %s1616_s16 = smov 128   ;;  %s1617_s22 = smov 8  }
  0x2b   : > { %1030 = dma.hbm_to_vmem [thread:$0]  (!%p1349_p13), %s259_s21, 3072, %s261_s23, %s249_s29, %s1616_s16, %s1616_s16, %s1617_s22  }
  0x2c   : > { %p915_p10 = scmp.ge.s32.totalorder %s1241_s27, 1  ;;  %p290_p0 = scmp.lt.s32.totalorder %s1241_s27, 3 }
  0x2d   : > { %s1015_s10 = smul.u32 48, %s1342_s14  ;;  %s271_s30 = scalar_lea.sflag [#allocation6], %s1342_s14 }
  0x2e   : > { %p1373_p2 = pnand %p915_p10, %p290_p0  ;;  %s1016_s9 = smul.u32 48, %s1241_s27 }
  0x2f   : > { %s274_s19 = scalar_lea.vmem [#allocation5], %s1015_s10  ;;  %s1116_s22 = scalar_lea.hbm %s1610_s5, 96 }
  0x30   : > { %s279_s18 = scalar_lea.hbm %s1610_s5, %s1016_s9  ;;  %s282_s4 = sshll.u32 %s274_s19, 4  ;;  %s283_s4 = int_to_ptr.vmem [resolvable:$true] %s282_s4 }
  0x31   : > { %s280_s26 = sshll.u32 %s279_s18, 4  ;;  %s281_s26 = int_to_ptr.hbm [resolvable:$true] %s280_s26 }
  0x32   : > { %s1109_s21 = sshra.s32 %s281_s26, 4  ;;  %s1110_s21 = int_to_ptr.hbm [resolvable:$true] %s1109_s21 }
  0x33   : > { %s1111_s23 = scalar_lea.hbm %s1110_s21, 48  ;;  %p1117_p7 = scmp.lt.s32.totalorder %s1110_s21, %s1610_s5 }
  0x34   : > { %p1112_p3 = scmp.ne.s32.totalorder %s1110_s21, %s1111_s23  ;;  %p1118_p8 = scmp.lt.s32.totalorder %s1116_s22, %s1111_s23 }
  0x36   : > { %p1114_p4 = pnand %p1112_p3, %p1083_p1  ;;  %p1119_p10 = por %p1118_p8, %p1117_p7 }
  0x38   : > { %p1115_p5 = pneg %p1114_p4 }
  0x3a   : > { %p1120_p0 = pnand %p1119_p10, %p1115_p5 }
  0x3c   : > { %1123 = shalt.err (!%p1120_p0)
}
  0x3d   : > { %s1628_s14 = smov 8   ;;  %s1629_s10 = smov 128  }
  0x3e   : > { %1033 = dma.hbm_to_vmem [thread:$0]  (!%p1349_p13), %s281_s26, 768, %s283_s4, %s271_s30, %s1629_s10, %s1629_s10, %s1628_s14  }
  0x3f   : > { %294 = sbr.rel (%p1373_p2) target bundleno = 439 (0x1b7), region = 44  ;;  %s1399_s16 = sand.u32 (!%p1373_p2), 1, %s1233_s25  }
  0x40   : > { %s1017_s17 = smul.u32 (!%p1373_p2), 192, %s1399_s16  ;;  %s297_s22 = scalar_lea.sflag (!%p1373_p2), [#allocation3], %s1399_s16 }
  0x42   : > { %s1403_s18 = scalar_lea.vmem (!%p1373_p2), [#allocation2], %s1017_s17 }
  0x44   : > { %1212 = dma.done.wait (%p1326_p6), %s297_s22, 3072  }
  0x45   : > { %1214 = vsyncadd (%p1326_p6), %s297_s22, 4294964224  ;;  %s1018_s4 = smul.u32 48, %s1399_s16  ;;  %s307_s26 = scalar_lea.sflag [#allocation6], %s1399_s16 }
  0x47   : > { %s1411_s30 = scalar_lea.vmem [#allocation5], %s1018_s4 }
  0x48   : > { %1216 = dma.done.wait (%p1326_p6), %s307_s26, 768  }
  0x49   : > { %1218 = vsyncadd (%p1326_p6), %s307_s26, 4294966528  ;;  %v367_v0 = vld [vmem:[%s1403_s18 + $0x20] sm:$0xff]  ;;  %v368_v1 = vld [vmem:[%s1403_s18 + $0x28] sm:$0xff]  ;;  %vm382_vm0 = vcmask 392192   ;;  %vm453_vm1 = vcmask 261120   ;;  %s917_s26 = sshll.u32 %s1399_s16, 5 }
  0x4a   : > { %v365_v2 = vld [vmem:[%s1403_s18 + $0x10] sm:$0xff]  ;;  %v371_v3 = vpack.c.bf16 %v368_v1, %v367_v0  ;;  %v366_v4 = vld [vmem:[%s1403_s18 + $0x18] sm:$0xff]  ;;  %v363_v6 = vld [vmem:[%s1403_s18] sm:$0xff]  ;;  %s1006_s11 = sshll.u32 %s1308_s28, 5  ;;  %s1005_s29 = sshll.u32 %s1308_s28, 7 }
  0x4b   : > { %v370_v5 = vpack.c.bf16 %v366_v4, %v365_v2  ;;  %v364_v7 = vld [vmem:[%s1403_s18 + $0x8] sm:$0xff]  ;;  %v946_v8 = vld [vmem:[%s1403_s18 + $0x50] sm:$0xff]  ;;  %v947_v9 = vld [vmem:[%s1403_s18 + $0x58] sm:$0xff]  ;;  %s777_s19 = scalar_lea.hbm %s1612_s7, %s1006_s11  ;;  %s749_s15 = scalar_lea.sflag [#allocation9], %s1399_s16 }
  0x4c   : > { %394 = vmatpush.bf16.msra.mxu0 %v371_v3  ;;  %1007 = vmatpush.bf16.msra.mxu2 %v371_v3  ;;  %v960_v10 = vld [vmem:[%s1403_s18 + $0x80] sm:$0xff]  ;;  %v961_v11 = vld [vmem:[%s1403_s18 + $0x88] sm:$0xff]  ;;  %v369_v12 = vpack.c.bf16 %v364_v7, %v363_v6  ;;  %v467_v13 = vpack.c.bf16 %v947_v9, %v946_v8  ;;  %v958_v17 = vld [vmem:[%s1403_s18 + $0x70] sm:$0xff]  ;;  %s780_s23 = sshll.u32 %s777_s19, 4  ;;  %s1159_s22 = scalar_lea.hbm %s1612_s7, 64  ;;  %s781_s23 = int_to_ptr.hbm [resolvable:$true] %s780_s23 }
  0x4d   : > { %v528_v14 = vpack.c.bf16 %v961_v11, %v960_v10  ;;  %v944_v15 = vld [vmem:[%s1403_s18 + $0x40] sm:$0xff]  ;;  %v945_v16 = vld [vmem:[%s1403_s18 + $0x48] sm:$0xff]  ;;  %v959_v18 = vld [vmem:[%s1403_s18 + $0x78] sm:$0xff]  ;;  %s1153_s9 = sshra.s32 %s781_s23, 4  ;;  %s1154_s9 = int_to_ptr.hbm [resolvable:$true] %s1153_s9 }
  0x4e   : > { %v1000_v19 = vld [vmem:[%s1605_s0] sm:$0xff]  ;;  %v1001_v20 = vld [vmem:[%s1605_s0 + $0x8] sm:$0xff]  ;;  %v466_v21 = vpack.c.bf16 %v945_v16, %v944_v15  ;;  %v527_v22 = vpack.c.bf16 %v959_v18, %v958_v17  ;;  %v942_v23 = vld [vmem:[%s1403_s18 + $0x30] sm:$0xff]  ;;  %s1155_s14 = scalar_lea.hbm %s1154_s9, 32  ;;  %p1160_p2 = scmp.lt.s32.totalorder %s1154_s9, %s1612_s7 }
  0x4f   : > { %v943_v24 = vld [vmem:[%s1403_s18 + $0x38] sm:$0xff]  ;;  %v956_v25 = vld [vmem:[%s1403_s18 + $0x60] sm:$0xff]  ;;  %v957_v26 = vld [vmem:[%s1403_s18 + $0x68] sm:$0xff]  ;;  %p1156_p6 = scmp.ne.s32.totalorder %s1154_s9, %s1155_s14  ;;  %p1161_p3 = scmp.lt.s32.totalorder %s1159_s22, %s1155_s14 }
  0x50   : > { %395 = vmatpush.bf16.msra.mxu0 %v370_v5  ;;  %1008 = vmatpush.bf16.msra.mxu2 %v370_v5  ;;  %v974_v27 = vld [vmem:[%s1403_s18 + $0xb0] sm:$0xff]  ;;  %v975_v28 = vld [vmem:[%s1403_s18 + $0xb8] sm:$0xff]  ;;  %v465_v29 = vpack.c.bf16 %v943_v24, %v942_v23  ;;  %v526_v30 = vpack.c.bf16 %v957_v26, %v956_v25  ;;  %v972_v32 = vld [vmem:[%s1403_s18 + $0xa0] sm:$0xff] }
  0x51   : > { %v589_v31 = vpack.c.bf16 %v975_v28, %v974_v27  ;;  %v973_v33 = vld [vmem:[%s1403_s18 + $0xa8] sm:$0xff]  ;;  %v655_v35 = vld [vmem:[%s1411_s30 + $0x20] sm:$0xff]  ;;  %v971_v38 = vld [vmem:[%s1403_s18 + $0x98] sm:$0xff]  ;;  %p1157_p13 = pnand %p1156_p6, %p1333_p11  ;;  %p1162_p4 = por %p1161_p3, %p1160_p2 }
  0x52   : > { %v656_v34 = vld [vmem:[%s1411_s30 + $0x28] sm:$0xff]  ;;  %v588_v36 = vpack.c.bf16 %v973_v33, %v972_v32  ;;  %v970_v37 = vld [vmem:[%s1403_s18 + $0x90] sm:$0xff]  ;;  %v654_v40 = vld [vmem:[%s1411_s30 + $0x18] sm:$0xff]  ;;  %s916_s18 = sshll.u32 %s1399_s16, 7 }
  0x53   : > { %v587_v39 = vpack.c.bf16 %v971_v38, %v970_v37  ;;  %v653_v41 = vld [vmem:[%s1411_s30 + $0x10] sm:$0xff]  ;;  %v652_v42 = vld [vmem:[%s1411_s30 + $0x8] sm:$0xff]  ;;  %v651_v43 = vld [vmem:[%s1411_s30] sm:$0xff]  ;;  %s1517_s4 = scalar_lea.vmem [#allocation7], %s916_s18  ;;  %s351_s30 = scalar_lea.vmem [#allocation8], %s917_s26 }
  0x54   : > { %396 = vmatpush.bf16.msra.mxu0 %v369_v12  ;;  %1009 = vmatpush.bf16.msra.mxu2 %v369_v12  ;;  %v641_v44 = vld [vmem:[%s1607_s2] sm:$0xff]  ;;  %v642_v45 = vld [vmem:[%s1607_s2 + $0x8] sm:$0xff]  ;;  %v643_v46 = vld [vmem:[%s1607_s2 + $0x10] sm:$0xff]  ;;  %s778_s21 = sshll.u32 %s351_s30, 4  ;;  %p1158_p1 = pneg %p1157_p13  ;;  %s779_s21 = int_to_ptr.vmem [resolvable:$true] %s778_s21 }
  0x55   : > { %v644_v47 = vld [vmem:[%s1607_s2 + $0x18] sm:$0xff]  ;;  %v1004_v48 = vld [vmem:[%s1606_s1 + $0x10] sm:$0xff]  ;;  %v1003_v49 = vld [vmem:[%s1606_s1 + $0x8] sm:$0xff] }
  0x56   : > { %439 = vmatpush.bf16.msra.mxu1 %v1004_v48  ;;  %1010 = vmatpush.bf16.msra.mxu3 %v1004_v48  ;;  %v1002_v50 = vld [vmem:[%s1606_s1] sm:$0xff]  ;;  %v650_v55 = vld [vmem:[%s1608_s3 + $0x28] sm:$0xff]  ;;  %v648_v60 = vld [vmem:[%s1608_s3 + $0x18] sm:$0xff]  ;;  %p1163_p5 = pnand %p1162_p4, %p1158_p1 }
  0x57   : > { %926 = vmatmul.msk.bf16.vlgmr.msra.gmra.mxu0 %vm382_vm0, %v1000_v19  ;;  %927 = vmatmul.msk.bf16.vlgmr.msra.gmra.mxu2 %vm382_vm0, %v1001_v20  ;;  %v649_v56 = vld [vmem:[%s1608_s3 + $0x20] sm:$0xff]  ;;  %v647_v62 = vld [vmem:[%s1608_s3 + $0x10] sm:$0xff]  ;;  %v646_v63 = vld [vmem:[%s1608_s3 + $0x8] sm:$0xff] }
  0x58   : > { %473 = vmatpush.bf16.msrb.mxu2 %v467_v13  ;;  %534 = vmatpush.bf16.msrb.mxu0 %v528_v14  ;;  %v645_v5 = vld [vmem:[%s1608_s3] sm:$0xff] }
  0x5a   : > { %440 = vmatpush.bf16.msra.mxu1 %v1003_v49  ;;  %1011 = vmatpush.bf16.msra.mxu3 %v1003_v49 }
  0x5c   : > { %474 = vmatpush.bf16.msrb.mxu2 %v466_v21  ;;  %535 = vmatpush.bf16.msrb.mxu0 %v527_v22 }
  0x5e   : > { %441 = vmatpush.bf16.msra.mxu1 %v1002_v50  ;;  %1012 = vmatpush.bf16.msra.mxu3 %v1002_v50 }
  0x60   : > { %475 = vmatpush.bf16.msrb.mxu2 %v465_v29  ;;  %536 = vmatpush.bf16.msrb.mxu0 %v526_v30 }
  0x62   : > { %561 = vmatpush.bf16.msrb.mxu1 %v1004_v48  ;;  %500 = vmatpush.bf16.msrb.mxu3 %v1004_v48 }
  0x64   : > { %595 = vmatpush.bf16.msra.mxu2 %v589_v31  ;;  %679 = vmatpush.msra.mxu0 %v656_v34 }
  0x66   : > { %680 = vmatpush.msra.mxu0 %v655_v35  ;;  %562 = vmatpush.bf16.msrb.mxu1 %v1003_v49 }
  0x67   : > { %948 = vmatmul.msk.bf16.vlgmr.msrb.gmra.mxu2 %vm382_vm0, %v1000_v19  ;;  %962 = vmatmul.msk.bf16.vlgmr.msrb.gmra.mxu0 %vm382_vm0, %v1000_v19 }
  0x68   : > { %596 = vmatpush.bf16.msra.mxu2 %v588_v36  ;;  %681 = vmatpush.msra.mxu0 %v654_v40 }
  0x69   : > { %501 = vmatpush.bf16.msrb.mxu3 %v1003_v49 }
  0x6a   : > { %682 = vmatpush.msra.mxu0 %v653_v41  ;;  %563 = vmatpush.bf16.msrb.mxu1 %v1002_v50 }
  0x6c   : > { %597 = vmatpush.bf16.msra.mxu2 %v587_v39  ;;  %683 = vmatpush.msra.mxu0 %v652_v42 }
  0x6d   : > { %502 = vmatpush.bf16.msrb.mxu3 %v1002_v50 }
  0x6e   : > { %684 = vmatpush.msra.mxu0 %v651_v43 }
  0x77   : > { %949 = vmatmul.msk.bf16.gmra.mxu2 %vm382_vm0, %v1001_v20  ;;  %963 = vmatmul.msk.bf16.gmra.mxu0 %vm382_vm0, %v1001_v20 }
  0x87   : > { %976 = vmatmul.msk.bf16.vlgmr.msra.gmra.mxu2 %vm382_vm0, %v1000_v19  ;;  %984 = vmatmul.msk.f32.vlgmr.msra.gmra.mxu0 %vm382_vm0, %v641_v44 }
  0x8f   : > { %985 = vmatmul.msk.f32.gmra.mxu0 %vm382_vm0, %v642_v45 }
  0x97   : > { %977 = vmatmul.msk.bf16.gmra.mxu2 %vm382_vm0, %v1001_v20  ;;  %986 = vmatmul.msk.f32.gmra.mxu0 %vm382_vm0, %v643_v46 }
  0x9f   : > { %987 = vmatmul.msk.f32.gmra.mxu0 %vm382_vm0, %v644_v47 }
  0xd4   : > { %v398_v51 = vpop.f32.mrf.mxu0 }
  0xda   : > { %v403_v52 = vpop.f32.mrf.mxu2 }
  0xdc   : > { %v400_v53 = vpop.f32.mrf.mxu0 }
  0xdd   : > { %v408_v54 = vpack.c.bf16 %v400_v53, %v398_v51 }
  0xdf   : > { %940 = vmatmul.msk.bf16.vlgmr.msra.gmra.mxu1 %vm382_vm0, %v408_v54 }
  0xe0   : > { %720 = vmatpush.msra.mxu1 %v650_v55 }
  0xe2   : > { %v405_v57 = vpop.f32.mrf.mxu2  ;;  %721 = vmatpush.msra.mxu1 %v649_v56 }
  0xe3   : > { %v409_v58 = vpack.c.bf16 %v405_v57, %v403_v52 }
  0xe4   : > { %v538_v59 = vpop.f32.mrf.mxu0  ;;  %722 = vmatpush.msra.mxu1 %v648_v60 }
  0xe5   : > { %941 = vmatmul.msk.bf16.vlgmr.msra.gmra.mxu3 %vm382_vm0, %v409_v58 }
  0xe6   : > { %622 = vmatpush.bf16.msra.mxu3 %v1004_v48  ;;  %723 = vmatpush.msra.mxu1 %v647_v62 }
  0xe8   : > { %724 = vmatpush.msra.mxu1 %v646_v63 }
  0xea   : > { %v477_v61 = vpop.f32.mrf.mxu2  ;;  %623 = vmatpush.bf16.msra.mxu3 %v1003_v49  ;;  %725 = vmatpush.msra.mxu1 %v645_v5 }
  0xec   : > { %v540_v0 = vpop.f32.mrf.mxu0 }
  0xed   : > { %v548_v1 = vpack.c.bf16 %v540_v0, %v538_v59 }
  0xee   : > { %624 = vmatpush.bf16.msra.mxu3 %v1002_v50 }
  0xef   : > { %964 = vmatmul.msk.bf16.vlgmr.msrb.gmra.mxu1 %vm382_vm0, %v548_v1 }
  0xf2   : > { %v479_v2 = vpop.f32.mrf.mxu2 }
  0xf3   : > { %v487_v3 = vpack.c.bf16 %v479_v2, %v477_v61 }
  0xf4   : > { %v543_v4 = vpop.f32.mrf.mxu0 }
  0xf5   : > { %950 = vmatmul.msk.bf16.vlgmr.msrb.gmra.mxu3 %vm382_vm0, %v487_v3 }
  0xfa   : > { %v482_v6 = vpop.f32.mrf.mxu2 }
  0xfc   : > { %v545_v7 = vpop.f32.mrf.mxu0 }
  0xfd   : > { %v549_v8 = vpack.c.bf16 %v545_v7, %v543_v4 }
  0xff   : > { %965 = vmatmul.msk.bf16.gmra.mxu1 %vm382_vm0, %v549_v8 }
 0x102   : > { %v484_v9 = vpop.f32.mrf.mxu2 }
 0x103   : > { %v488_v10 = vpack.c.bf16 %v484_v9, %v482_v6 }
 0x104   : > { %v686_v11 = vpop.f32.mrf.mxu0 }
 0x105   : > { %951 = vmatmul.msk.bf16.gmra.mxu3 %vm382_vm0, %v488_v10 }
 0x10a   : > { %v599_v12 = vpop.f32.mrf.mxu2 }
 0x10c   : > { %v689_v13 = vpop.f32.mrf.mxu0 }
 0x10f   : > { %988 = vmatmul.msk.f32.vlgmr.msra.gmra.mxu1 %vm382_vm0, %v686_v11 }
 0x112   : > { %v601_v14 = vpop.f32.mrf.mxu2 }
 0x113   : > { %v609_v15 = vpack.c.bf16 %v601_v14, %v599_v12 }
 0x114   : > { %v692_v17 = vpop.f32.mrf.mxu0 }
 0x115   : > { %978 = vmatmul.msk.bf16.vlgmr.msra.gmra.mxu3 %vm382_vm0, %v609_v15 }
 0x117   : > { %989 = vmatmul.msk.f32.gmra.mxu1 %vm382_vm0, %v689_v13 }
 0x11a   : > { %v604_v16 = vpop.f32.mrf.mxu2 }
 0x11c   : > { %v695_v20 = vpop.f32.mrf.mxu0 }
 0x11f   : > { %990 = vmatmul.msk.f32.gmra.mxu1 %vm382_vm0, %v692_v17 }
 0x122   : > { %v606_v18 = vpop.f32.mrf.mxu2 }
 0x123   : > { %v610_v19 = vpack.c.bf16 %v606_v18, %v604_v16 }
 0x125   : > { %979 = vmatmul.msk.bf16.gmra.mxu3 %vm382_vm0, %v610_v19 }
 0x127   : > { %991 = vmatmul.msk.f32.gmra.mxu1 %vm382_vm0, %v695_v20 }
 0x15c   : > { %v443_v21 = vpop.f32.mrf.mxu1 }
 0x15d   : > { %454 = vst.msk [vmem:[%s1517_s4] sm:$0xff] %vm453_vm1, %v443_v21 }
 0x164   : > { %v445_v22 = vpop.f32.mrf.mxu1 }
 0x165   : > { %455 = vst.msk [vmem:[%s1517_s4 + $0x8] sm:$0xff] %vm453_vm1, %v445_v22 }
 0x168   : > { %v448_v23 = vpop.f32.mrf.mxu3 }
 0x169   : > { %456 = vst.msk [vmem:[%s1517_s4 + $0x10] sm:$0xff] %vm453_vm1, %v448_v23 }
 0x16c   : > { %v565_v24 = vpop.f32.mrf.mxu1 }
 0x16d   : > { %966 = vst.msk [vmem:[%s1517_s4 + $0x40] sm:$0xff] %vm453_vm1, %v565_v24 }
 0x170   : > { %v450_v25 = vpop.f32.mrf.mxu3 }
 0x171   : > { %457 = vst.msk [vmem:[%s1517_s4 + $0x18] sm:$0xff] %vm453_vm1, %v450_v25 }
 0x174   : > { %v567_v26 = vpop.f32.mrf.mxu1 }
 0x175   : > { %967 = vst.msk [vmem:[%s1517_s4 + $0x48] sm:$0xff] %vm453_vm1, %v567_v26 }
 0x178   : > { %v504_v27 = vpop.f32.mrf.mxu3 }
 0x179   : > { %952 = vst.msk [vmem:[%s1517_s4 + $0x20] sm:$0xff] %vm453_vm1, %v504_v27 }
 0x17c   : > { %v570_v28 = vpop.f32.mrf.mxu1 }
 0x17d   : > { %968 = vst.msk [vmem:[%s1517_s4 + $0x50] sm:$0xff] %vm453_vm1, %v570_v28 }
 0x180   : > { %v506_v29 = vpop.f32.mrf.mxu3 }
 0x181   : > { %953 = vst.msk [vmem:[%s1517_s4 + $0x28] sm:$0xff] %vm453_vm1, %v506_v29 }
 0x184   : > { %v572_v30 = vpop.f32.mrf.mxu1 }
 0x185   : > { %969 = vst.msk [vmem:[%s1517_s4 + $0x58] sm:$0xff] %vm453_vm1, %v572_v30 }
 0x188   : > { %v509_v31 = vpop.f32.mrf.mxu3 }
 0x189   : > { %954 = vst.msk [vmem:[%s1517_s4 + $0x30] sm:$0xff] %vm453_vm1, %v509_v31 }
 0x18c   : > { %v727_v32 = vpop.f32.mrf.mxu1 }
 0x18d   : > { %739 = vst.msk [vmem:[%s351_s30] sm:$0xff] %vm453_vm1, %v727_v32 }
 0x190   : > { %v511_v33 = vpop.f32.mrf.mxu3 }
 0x191   : > { %955 = vst.msk [vmem:[%s1517_s4 + $0x38] sm:$0xff] %vm453_vm1, %v511_v33 }
 0x194   : > { %v730_v34 = vpop.f32.mrf.mxu1 }
 0x195   : > { %740 = vst.msk [vmem:[%s351_s30 + $0x8] sm:$0xff] %vm453_vm1, %v730_v34 }
 0x198   : > { %v626_v35 = vpop.f32.mrf.mxu3 }
 0x199   : > { %980 = vst.msk [vmem:[%s1517_s4 + $0x60] sm:$0xff] %vm453_vm1, %v626_v35 }
 0x19c   : > { %v733_v36 = vpop.f32.mrf.mxu1 }
 0x19d   : > { %741 = vst.msk [vmem:[%s351_s30 + $0x10] sm:$0xff] %vm453_vm1, %v733_v36 }
 0x1a0   : > { %v628_v37 = vpop.f32.mrf.mxu3 }
 0x1a1   : > { %981 = vst.msk [vmem:[%s1517_s4 + $0x68] sm:$0xff] %vm453_vm1, %v628_v37 }
 0x1a4   : > { %v736_v38 = vpop.f32.mrf.mxu1 }
 0x1a5   : > { %742 = vst.msk [vmem:[%s351_s30 + $0x18] sm:$0xff] %vm453_vm1, %v736_v38 }
 0x1a6   : > { %1166 = shalt.err (!%p1163_p5)
}
 0x1a7   : > { %s1245_s28 = smov 128   ;;  %s1246_s30 = smov 8  }
 0x1a8   : > { %1024 = dma.vmem_to_hbm [thread:$0]  (%p1333_p11), %s779_s21, 512, %s781_s23, %s749_s15, %s1245_s28, %s1245_s28, %s1246_s30   ;;  %v631_v39 = vpop.f32.mrf.mxu3 }
 0x1a9   : > { %982 = vst.msk [vmem:[%s1517_s4 + $0x70] sm:$0xff] %vm453_vm1, %v631_v39  ;;  %s760_s8 = scalar_lea.hbm %s1611_s6, %s1005_s29  ;;  %s761_s19 = sshll.u32 %s1517_s4, 4  ;;  %s762_s19 = int_to_ptr.vmem [resolvable:$true] %s761_s19 }
 0x1aa   : > { %s763_s9 = sshll.u32 %s760_s8, 4  ;;  %s744_s14 = scalar_lea.sflag [#allocation4], %s1399_s16  ;;  %s764_s9 = int_to_ptr.hbm [resolvable:$true] %s763_s9 }
 0x1ab   : > { %s1181_s10 = sshra.s32 %s764_s9, 4  ;;  %s1187_s15 = scalar_lea.hbm %s1611_s6, 256  ;;  %s1182_s10 = int_to_ptr.hbm [resolvable:$true] %s1181_s10 }
 0x1ac   : > { %s1183_s17 = scalar_lea.hbm %s1182_s10, 128  ;;  %p1188_p0 = scmp.lt.s32.totalorder %s1182_s10, %s1611_s6 }
 0x1ad   : > { %p1184_p7 = scmp.ne.s32.totalorder %s1182_s10, %s1183_s17  ;;  %p1189_p6 = scmp.lt.s32.totalorder %s1187_s15, %s1183_s17 }
 0x1af   : > { %p1185_p8 = pnand %p1184_p7, %p1333_p11  ;;  %p1190_p13 = por %p1189_p6, %p1188_p0 }
 0x1b0   : > { %v633_v40 = vpop.f32.mrf.mxu3 }
 0x1b1   : > { %983 = vst.msk [vmem:[%s1517_s4 + $0x78] sm:$0xff] %vm453_vm1, %v633_v40  ;;  %p1186_p10 = pneg %p1185_p8 }
 0x1b3   : > { %p1191_p1 = pnand %p1190_p13, %p1186_p10 }
 0x1b5   : > { %1194 = shalt.err (!%p1191_p1)
}
 0x1b6   : > { %1023 = dma.vmem_to_hbm [thread:$0]  (%p1333_p11), %s762_s19, 2048, %s764_s9, %s744_s14, %s1245_s28, %s1245_s28, %s1246_s30  }
 0x1b7 PF: > { %s795_s16 = sand.u32 1, %s1229_s24   ;;  %p1035_p2 = pnand %p912_p9, %p1337_p12 }
 0x1b8   : > { %s796_s4 = scalar_lea.sflag [#allocation4], %s795_s16 }
 0x1b9   : > { %p1036_p3 = pneg %p1035_p2 }
 0x1bb   : > { %1220 = dma.done.wait (%p1036_p3), %s796_s4, 2048  }
 0x1bc   : > { %1222 = vsyncadd (%p1036_p3), %s796_s4, 4294965248  ;;  %s806_s18 = scalar_lea.sflag [#allocation9], %s795_s16 }
 0x1bd   : > { %1224 = dma.done.wait (%p1036_p3), %s806_s18, 512  }
 0x1be   : > { %1226 = vsyncadd (%p1036_p3), %s806_s18, 4294966784  ;;  %s1630_s27 = sld [smem:[#allocation15_spill]]  ;;  %s1633_s24 = smov %s1233_s25 }
 0x1bf   : > { %s1631_s26 = sld [smem:[#allocation14_spill]] }
 0x1c0   : > { %s1632_s12 = sld [smem:[#allocation16_spill]] }
 0x1c4   : > { %p27_p11 = scmp.ge.s32.totalorder %s1630_s27, 4  }
 0x1c5   : > { %s1634_s25 = smov %s1631_s26 }
 0x1c6   : > { %s1635_s26 = smov %s1632_s12  ;;  %29 = sbr.rel (!%p27_p11) target bundleno = 11 (0xb), region = 125 }
 0x1cb   :  { %812 = vsyncpa [#allocation3], 1 }
 0x1cc   :  { %814 = vsyncpa [#allocation3 + $0x1], 1 }
 0x1cd   :  { %815 = vsyncpa [#allocation6], 1 }
 0x1ce   :  { %817 = vsyncpa [#allocation6 + $0x1], 1 }
 0x1cf   :  { %818 = vsyncpa [#allocation4], 1 }
 0x1d0   :  { %820 = vsyncpa [#allocation4 + $0x1], 1 }
 0x1d1   :  { %821 = vsyncpa [#allocation9], 1 }
 0x1d2   :  { %823 = vsyncpa [#allocation9 + $0x1], 1 }

</bundles_post_ra>
